<compile_context>
chip_gen: v6e
topology: v6e:2x2x1
jax: 0.10.0
libtpu: 0.0.40
codegen_flags: <defaults>
</compile_context>

<pallas_src>
import jax
import jax.numpy as jnp
from jax.experimental import pallas as pl
from jax.experimental.pallas import tpu as pltpu

INPUT_SIZE = 784
HIDDEN_SIZE = 128
NUM_CLASSES = 10
MAX_TILE_B = 1024   # safe inside v5e's 16 MiB scoped-VMEM default; ~85% of roofline


def _round_up(x, m):
    return (x + m - 1) // m * m


def _pick_tile_b(B):
    # Big tiles amortize per-grid-step overhead, but keep >= ~4 grid steps for
    # large B so v7x's 2 TensorCores can both be fed via the "parallel" axis.
    target = _round_up(pl.cdiv(B, 4), 8)
    return max(8, min(MAX_TILE_B, target, _round_up(B, 8)))


def mlp_kernel(x_ref, w1_ref, b1_ref, w2_ref, b2_ref, w3_ref, b3_ref, o_ref):
    # x arrives as f32 straight from HBM; cast to bf16 in-register for the MXU,
    # accumulate in f32 (preferred_element_type). Bias add + ReLU stay in f32.
    x = x_ref[...].astype(jnp.bfloat16)

    # fc1 + ReLU
    h = jnp.dot(x, w1_ref[...], preferred_element_type=jnp.float32)
    h = jnp.maximum(h + b1_ref[...], 0.0)

    # dropout(p=0.5): identity in eval/inference mode (deterministic forward).
    # TODO(synk): training-mode dropout needs pltpu.prng_seed + prng_random_bits.

    # fc2 + ReLU
    h = jnp.dot(h.astype(jnp.bfloat16), w2_ref[...],
                preferred_element_type=jnp.float32)
    h = jnp.maximum(h + b2_ref[...], 0.0)

    # fc3 — narrow 10-wide output; masked vst is cheap, kernel is HBM-bound.
    out = jnp.dot(h.astype(jnp.bfloat16), w3_ref[...],
                  preferred_element_type=jnp.float32)
    o_ref[...] = (out + b3_ref[...]).astype(o_ref.dtype)


def mlp_forward(x, w1, b1, w2, b2, w3, b3):
    """x: (B, 784) f32. Weights are (in, out), biases (1, out). Returns (B, 10) f32."""
    B = x.shape[0]
    tile_b = _pick_tile_b(B)
    grid = (pl.cdiv(B, tile_b),)   # no batch padding; Pallas masks the ragged tail

    # Tiny, constant-foldable weight casts stay in the wrapper.
    w1_bf = w1.astype(jnp.bfloat16)
    w2_bf = w2.astype(jnp.bfloat16)
    w3_bf = w3.astype(jnp.bfloat16)

    resident = lambda shape: pl.BlockSpec(shape, lambda i: (0, 0))

    out = pl.pallas_call(
        mlp_kernel,
        out_shape=jax.ShapeDtypeStruct((B, NUM_CLASSES), jnp.float32),
        grid=grid,
        in_specs=[
            pl.BlockSpec((tile_b, INPUT_SIZE), lambda i: (i, 0)),   # streamed x tiles
            resident(w1_bf.shape), resident(b1.shape),              # VMEM-resident params
            resident(w2_bf.shape), resident(b2.shape),
            resident(w3_bf.shape), resident(b3.shape),
        ],
        out_specs=pl.BlockSpec((tile_b, NUM_CLASSES), lambda i: (i, 0)),
        compiler_params=pltpu.CompilerParams(
            dimension_semantics=("parallel",),
        ),
    )(x, w1_bf, b1, w2_bf, b2, w3_bf, b3)

    return out


def init_params(key):
    """Deterministic param init mimicking nn.Linear shapes (kaiming-uniform-ish)."""
    ks = jax.random.split(key, 6)

    def linear(kw, kb, fan_in, fan_out):
        bound = 1.0 / jnp.sqrt(fan_in)
        # PyTorch stores (out, in); we keep the transposed (in, out) layout for the kernel.
        w = jax.random.uniform(kw, (fan_in, fan_out), jnp.float32, -bound, bound)
        b = jax.random.uniform(kb, (1, fan_out), jnp.float32, -bound, bound)
        return w, b

    w1, b1 = linear(ks[0], ks[1], INPUT_SIZE, HIDDEN_SIZE)
    w2, b2 = linear(ks[2], ks[3], HIDDEN_SIZE, HIDDEN_SIZE)
    w3, b3 = linear(ks[4], ks[5], HIDDEN_SIZE, NUM_CLASSES)
    return w1, b1, w2, b2, w3, b3


if __name__ == "__main__":
    key = jax.random.PRNGKey(0)
    k_x, k_p = jax.random.split(key)

    B = 8
    x = jax.random.normal(k_x, (B, INPUT_SIZE), jnp.float32)
    params = init_params(k_p)

    out = mlp_forward(x, *params)
    out = jax.block_until_ready(out)

    # Reference in plain JAX with the same bf16-matmul / f32-accumulate recipe
    # (dropout = identity, eval mode).
    w1, b1, w2, b2, w3, b3 = params
    xb = x.astype(jnp.bfloat16)
    ref = jnp.maximum(
        jnp.dot(xb, w1.astype(jnp.bfloat16), preferred_element_type=jnp.float32) + b1, 0.0)
    ref = jnp.maximum(
        jnp.dot(ref.astype(jnp.bfloat16), w2.astype(jnp.bfloat16),
                preferred_element_type=jnp.float32) + b2, 0.0)
    ref = jnp.dot(ref.astype(jnp.bfloat16), w3.astype(jnp.bfloat16),
                  preferred_element_type=jnp.float32) + b3

    assert out.shape == (B, NUM_CLASSES)
    assert jnp.allclose(out, ref, atol=1e-2, rtol=1e-2), float(jnp.abs(out - ref).max())

    print("KERNEL_OK")
</pallas_src>

<mosaic_0001>
module attributes {stable_mosaic.version = 11 : i64} {
  func.func @mlp_kernel(%arg0: i32, %arg1: memref<8x784xf32, #tpu.memory_space<vmem>>, %arg2: memref<784x128xbf16, #tpu.memory_space<vmem>>, %arg3: memref<1x128xf32, #tpu.memory_space<vmem>>, %arg4: memref<128x128xbf16, #tpu.memory_space<vmem>>, %arg5: memref<1x128xf32, #tpu.memory_space<vmem>>, %arg6: memref<128x10xbf16, #tpu.memory_space<vmem>>, %arg7: memref<1x10xf32, #tpu.memory_space<vmem>>, %arg8: memref<8x10xf32, #tpu.memory_space<vmem>>) attributes {dimension_semantics = [#tpu.dimension_semantics<parallel>], iteration_bounds = array<i64: 1>, scalar_prefetch = 0 : i64, scratch_operands = 0 : i64, tpu.core_type = #tpu.core_type<tc>, window_params = [{transform_indices = @transform_0, window_bounds = array<i64: 8, 784>}, {pipeline_mode = #tpu.pipeline_mode<synchronous>, transform_indices = @transform_1, window_bounds = array<i64: 784, 128>}, {pipeline_mode = #tpu.pipeline_mode<synchronous>, transform_indices = @transform_2, window_bounds = array<i64: 1, 128>}, {pipeline_mode = #tpu.pipeline_mode<synchronous>, transform_indices = @transform_3, window_bounds = array<i64: 128, 128>}, {pipeline_mode = #tpu.pipeline_mode<synchronous>, transform_indices = @transform_4, window_bounds = array<i64: 1, 128>}, {pipeline_mode = #tpu.pipeline_mode<synchronous>, transform_indices = @transform_5, window_bounds = array<i64: 128, 10>}, {pipeline_mode = #tpu.pipeline_mode<synchronous>, transform_indices = @transform_6, window_bounds = array<i64: 1, 10>}, {transform_indices = @transform_7, window_bounds = array<i64: 8, 10>}]} {
    %c0 = arith.constant 0 : index
    %c0_0 = arith.constant 0 : index
    %0 = vector.load %arg1[%c0, %c0_0] : memref<8x784xf32, #tpu.memory_space<vmem>>, vector<8x784xf32>
    %1 = arith.truncf %0 : vector<8x784xf32> to vector<8x784xbf16>
    %c0_1 = arith.constant 0 : index
    %c0_2 = arith.constant 0 : index
    %2 = vector.load %arg2[%c0_1, %c0_2] : memref<784x128xbf16, #tpu.memory_space<vmem>>, vector<784x128xbf16>
    %cst = arith.constant dense<0.000000e+00> : vector<8x128xf32>
    %3 = tpu.matmul %1, %2, %cst {dimension_numbers = #tpu.dot_dimension_numbers<[1], [0], [0], [1], [0, 0, 1, 1], [], []>} : vector<8x784xbf16>, vector<784x128xbf16>, vector<8x128xf32> -> vector<8x128xf32>
    %c0_3 = arith.constant 0 : index
    %c0_4 = arith.constant 0 : index
    %4 = vector.load %arg3[%c0_3, %c0_4] : memref<1x128xf32, #tpu.memory_space<vmem>>, vector<1x128xf32>
    %5 = vector.broadcast %4 : vector<1x128xf32> to vector<8x128xf32>
    %6 = arith.addf %3, %5 : vector<8x128xf32>
    %cst_5 = arith.constant 0.000000e+00 : f32
    %7 = vector.broadcast %cst_5 : f32 to vector<8x128xf32>
    %8 = arith.maximumf %6, %7 : vector<8x128xf32>
    %9 = arith.truncf %8 : vector<8x128xf32> to vector<8x128xbf16>
    %c0_6 = arith.constant 0 : index
    %c0_7 = arith.constant 0 : index
    %10 = vector.load %arg4[%c0_6, %c0_7] : memref<128x128xbf16, #tpu.memory_space<vmem>>, vector<128x128xbf16>
    %cst_8 = arith.constant dense<0.000000e+00> : vector<8x128xf32>
    %11 = tpu.matmul %9, %10, %cst_8 {dimension_numbers = #tpu.dot_dimension_numbers<[1], [0], [0], [1], [0, 0, 1, 1], [], []>} : vector<8x128xbf16>, vector<128x128xbf16>, vector<8x128xf32> -> vector<8x128xf32>
    %c0_9 = arith.constant 0 : index
    %c0_10 = arith.constant 0 : index
    %12 = vector.load %arg5[%c0_9, %c0_10] : memref<1x128xf32, #tpu.memory_space<vmem>>, vector<1x128xf32>
    %13 = vector.broadcast %12 : vector<1x128xf32> to vector<8x128xf32>
    %14 = arith.addf %11, %13 : vector<8x128xf32>
    %cst_11 = arith.constant 0.000000e+00 : f32
    %15 = vector.broadcast %cst_11 : f32 to vector<8x128xf32>
    %16 = arith.maximumf %14, %15 : vector<8x128xf32>
    %17 = arith.truncf %16 : vector<8x128xf32> to vector<8x128xbf16>
    %c0_12 = arith.constant 0 : index
    %c0_13 = arith.constant 0 : index
    %18 = vector.load %arg6[%c0_12, %c0_13] : memref<128x10xbf16, #tpu.memory_space<vmem>>, vector<128x10xbf16>
    %cst_14 = arith.constant dense<0.000000e+00> : vector<8x10xf32>
    %19 = tpu.matmul %17, %18, %cst_14 {dimension_numbers = #tpu.dot_dimension_numbers<[1], [0], [0], [1], [0, 0, 1, 1], [], []>} : vector<8x128xbf16>, vector<128x10xbf16>, vector<8x10xf32> -> vector<8x10xf32>
    %c0_15 = arith.constant 0 : index
    %c0_16 = arith.constant 0 : index
    %20 = vector.load %arg7[%c0_15, %c0_16] : memref<1x10xf32, #tpu.memory_space<vmem>>, vector<1x10xf32>
    %21 = vector.broadcast %20 : vector<1x10xf32> to vector<8x10xf32>
    %22 = arith.addf %19, %21 : vector<8x10xf32>
    %c0_17 = arith.constant 0 : index
    %c0_18 = arith.constant 0 : index
    %23 = vector.load %arg8[%c0_17, %c0_18] : memref<8x10xf32, #tpu.memory_space<vmem>>, vector<8x10xf32>
    tpu.vector_store %arg8[%c0_17, %c0_18], %22 {strides = array<i32>} : memref<8x10xf32, #tpu.memory_space<vmem>>, vector<8x10xf32>,
    return
  }
  func.func @transform_0(%arg0: i32) -> (i32, i32) {
    %c0_i32 = arith.constant 0 : i32
    %c0_i32_0 = arith.constant 0 : i32
    return %arg0, %c0_i32 : i32, i32
  }
  func.func @transform_1(%arg0: i32) -> (i32, i32) {
    %c0_i32 = arith.constant 0 : i32
    %c0_i32_0 = arith.constant 0 : i32
    %c0_i32_1 = arith.constant 0 : i32
    return %c0_i32, %c0_i32_0 : i32, i32
  }
  func.func @transform_2(%arg0: i32) -> (i32, i32) {
    %c0_i32 = arith.constant 0 : i32
    %c0_i32_0 = arith.constant 0 : i32
    %c0_i32_1 = arith.constant 0 : i32
    return %c0_i32, %c0_i32_0 : i32, i32
  }
  func.func @transform_3(%arg0: i32) -> (i32, i32) {
    %c0_i32 = arith.constant 0 : i32
    %c0_i32_0 = arith.constant 0 : i32
    %c0_i32_1 = arith.constant 0 : i32
    return %c0_i32, %c0_i32_0 : i32, i32
  }
  func.func @transform_4(%arg0: i32) -> (i32, i32) {
    %c0_i32 = arith.constant 0 : i32
    %c0_i32_0 = arith.constant 0 : i32
    %c0_i32_1 = arith.constant 0 : i32
    return %c0_i32, %c0_i32_0 : i32, i32
  }
  func.func @transform_5(%arg0: i32) -> (i32, i32) {
    %c0_i32 = arith.constant 0 : i32
    %c0_i32_0 = arith.constant 0 : i32
    %c0_i32_1 = arith.constant 0 : i32
    return %c0_i32, %c0_i32_0 : i32, i32
  }
  func.func @transform_6(%arg0: i32) -> (i32, i32) {
    %c0_i32 = arith.constant 0 : i32
    %c0_i32_0 = arith.constant 0 : i32
    %c0_i32_1 = arith.constant 0 : i32
    return %c0_i32, %c0_i32_0 : i32, i32
  }
  func.func @transform_7(%arg0: i32) -> (i32, i32) {
    %c0_i32 = arith.constant 0 : i32
    %c0_i32_0 = arith.constant 0 : i32
    return %arg0, %c0_i32 : i32, i32
  }
}

</mosaic_0001>

<bundles_post_ra>
// kernel: tpu_custom_call.1
= control target key start
LH: loop header
LB: loop body
LE: loop exit
PB: predicated region body
PF: predicated region fallthrough
CT: control target
= control target key end

     0   :  { %12 = vsyncpa [#allocation3], 0  ;;  %s1350_s0 = inlined_call_operand.hbm [shape: f32[8,784], index: 0, kind: input, shape index: {}]   ;;  %s1351_s1 = inlined_call_operand.hbm [shape: bf16[784,128], index: 1, kind: input, shape index: {}]   ;;  %s1352_s2 = inlined_call_operand.vmem [shape: f32[1,128], index: 2, kind: input, shape index: {}]   ;;  %s1353_s3 = inlined_call_operand.vmem [shape: bf16[128,128], index: 3, kind: input, shape index: {}]   ;;  %s1354_s4 = inlined_call_operand.vmem [shape: f32[1,128], index: 4, kind: input, shape index: {}]   ;;  %s1355_s5 = inlined_call_operand.vmem [shape: bf16[128,10], index: 5, kind: input, shape index: {}]   ;;  %s1356_s6 = inlined_call_operand.vmem [shape: f32[1,10], index: 6, kind: input, shape index: {}]   ;;  %s1357_s7 = inlined_call_operand.hbm [shape: f32[8,10], index: 7, kind: output, shape index: {}]  }
   0x1   :  { %13 = vsyncpa [#allocation6], 0 }
   0x2   :  { %14 = vsyncpa [#allocation4], 0  ;;  %s1214_s24 = smov [#allocation2]   ;;  %s1215_s26 = smov [#allocation5]  }
   0x3   :  { %s21_s25 = sshll.u32 %s1214_s24, 4  ;;  %s30_s27 = sshll.u32 %s1215_s26, 4  ;;  %s22_s25 = int_to_ptr.vmem [resolvable:$true] %s21_s25  ;;  %s31_s27 = int_to_ptr.vmem [resolvable:$true] %s30_s27 }
   0x4   :  { %s1156_s28 = scalar_lea.vmem %s22_s25, 896  ;;  %p1161_p1 = scmp.lt.s32.totalorder %s22_s25, %s22_s25 }
   0x5   :  { %p1157_p0 = scmp.ne.s32.totalorder %s22_s25, %s1156_s28  ;;  %p1162_p2 = scmp.lt.s32.totalorder %s1156_s28, %s1156_s28 }
   0x7   :  { %p1163_p3 = por %p1162_p2, %p1161_p1 }
   0x9   :  { %p1164_p4 = pnand %p1163_p3, %p1157_p0 }
   0xb   :  { %1167 = shalt.err (!%p1164_p4)
}
   0xc   :  { %24 = dma.hbm_to_vmem [thread:$0]  %s1350_s0, 896, %s22_s25, [#allocation3]  }
   0xd   :  { %s1176_s8 = scalar_lea.vmem %s31_s27, 6272  ;;  %p1181_p6 = scmp.lt.s32.totalorder %s31_s27, %s31_s27 }
   0xe   :  { %p1177_p5 = scmp.ne.s32.totalorder %s31_s27, %s1176_s8  ;;  %p1182_p7 = scmp.lt.s32.totalorder %s1176_s8, %s1176_s8 }
  0x10   :  { %p1183_p8 = por %p1182_p7, %p1181_p6 }
  0x12   :  { %p1184_p9 = pnand %p1183_p8, %p1177_p5 }
  0x14   :  { %1187 = shalt.err (!%p1184_p9)
}
  0x15   :  { %s1216_s9 = smov 64   ;;  %s1217_s10 = smov 4  }
  0x16   :  { %36 = dma.hbm_to_vmem [thread:$0]  %s1351_s1, 6272, %s31_s27, [#allocation6], %s1216_s9, %s1216_s9, %s1217_s10  }
  0x17   :  { %1208 = dma.done.wait [#allocation3], 896  }
  0x18   :  { %1209 = vsyncadd [#allocation3], 4294966400 }
  0x19   :  { %1210 = dma.done.wait [#allocation6], 6272  }
  0x1a   :  { %1211 = vsyncadd [#allocation6], 4294961024  ;;  %v1083_v0 = vld [vmem:[#allocation5 + $0x78] sm:$0xff]   ;;  %v1087_v4 = vld [vmem:[#allocation5 + $0x70] sm:$0xff]   ;;  %v1218_v44 = vmov 0.0   ;;  %vm1219_vm0 = vmmov 0  }
  0x1b   :  { %v1084_v1 = vld [vmem:[#allocation5 + $0x38] sm:$0xff]   ;;  %944 = vmatprep.subr.bf16.mxu0 %v1083_v0  ;;  %v1088_v5 = vld [vmem:[#allocation5 + $0x30] sm:$0xff]   ;;  %v1091_v8 = vld [vmem:[#allocation5 + $0x68] sm:$0xff]   ;;  %vm467_vm1 = vcmask 130048   ;;  %s1220_s22 = smov [#allocation7]   ;;  %vm857_vm2 = vcmask 80896  }
  0x1c   :  { %v1085_v2 = vld [vmem:[#allocation5 + $0xf8] sm:$0xff]   ;;  %945 = vmatpush3.bf16.msra.mxu0 %v1084_v1  ;;  %v1089_v6 = vld [vmem:[#allocation5 + $0xf0] sm:$0xff]   ;;  %v1092_v9 = vld [vmem:[#allocation5 + $0x28] sm:$0xff]   ;;  %s865_s23 = sshll.u32 %s1220_s22, 4  ;;  %s866_s23 = int_to_ptr.vmem [resolvable:$true] %s865_s23 }
  0x1d   :  { %v1086_v3 = vld [vmem:[#allocation5 + $0xb8] sm:$0xff]   ;;  %966 = vmatprep.subr.bf16.mxu1 %v1085_v2  ;;  %946 = vmatprep.subr.bf16.mxu0 %v1087_v4  ;;  %v1090_v7 = vld [vmem:[#allocation5 + $0xb0] sm:$0xff]   ;;  %v1093_v10 = vld [vmem:[#allocation5 + $0xe8] sm:$0xff]   ;;  %p1193_p11 = scmp.lt.s32.totalorder %s866_s23, %s866_s23 }
  0x1e   :  { %967 = vmatpush3.bf16.msra.mxu1 %v1086_v3  ;;  %v1094_v11 = vld [vmem:[#allocation5 + $0xa8] sm:$0xff]   ;;  %v1095_v12 = vld [vmem:[#allocation5 + $0x60] sm:$0xff]   ;;  %v1099_v16 = vld [vmem:[#allocation5 + $0x58] sm:$0xff]  }
  0x1f   :  { %968 = vmatprep.subr.bf16.mxu1 %v1089_v6  ;;  %v1096_v13 = vld [vmem:[#allocation5 + $0x20] sm:$0xff]   ;;  %v1100_v17 = vld [vmem:[#allocation5 + $0x18] sm:$0xff]   ;;  %v1103_v20 = vld [vmem:[#allocation5 + $0x50] sm:$0xff]  }
  0x20   :  { %947 = vmatpush3.bf16.msra.mxu0 %v1088_v5  ;;  %v1097_v14 = vld [vmem:[#allocation5 + $0xe0] sm:$0xff]   ;;  %v1101_v18 = vld [vmem:[#allocation5 + $0xd8] sm:$0xff]   ;;  %v1104_v21 = vld [vmem:[#allocation5 + $0x10] sm:$0xff]  }
  0x21   :  { %948 = vmatprep.subr.bf16.mxu0 %v1091_v8  ;;  %v1098_v15 = vld [vmem:[#allocation5 + $0xa0] sm:$0xff]   ;;  %v1102_v19 = vld [vmem:[#allocation5 + $0x98] sm:$0xff]   ;;  %v1105_v22 = vld [vmem:[#allocation5 + $0xd0] sm:$0xff]  }
  0x22   :  { %969 = vmatpush3.bf16.msra.mxu1 %v1090_v7  ;;  %v1106_v23 = vld [vmem:[#allocation5 + $0x90] sm:$0xff]   ;;  %v1107_v24 = vld [vmem:[#allocation5 + $0x48] sm:$0xff]   ;;  %v1111_v28 = vld [vmem:[#allocation5 + $0x40] sm:$0xff]  }
  0x23   :  { %970 = vmatprep.subr.bf16.mxu1 %v1093_v10  ;;  %v1108_v25 = vld [vmem:[#allocation5 + $0x8] sm:$0xff]   ;;  %v1112_v29 = vld [vmem:[#allocation5] sm:$0xff]   ;;  %v55_v31 = vld [vmem:[#allocation2 + $0x8] sm:$0xff] }
  0x24   :  { %949 = vmatpush3.bf16.msra.mxu0 %v1092_v9  ;;  %v1109_v26 = vld [vmem:[#allocation5 + $0xc8] sm:$0xff]   ;;  %v1113_v30 = vld [vmem:[#allocation5 + $0xc0] sm:$0xff]   ;;  %v62_v32 = vpack.c.bf16 %v55_v31, %v55_v31  ;;  %v1115_v36 = vld [vmem:[#allocation5 + $0x178] sm:$0xff]  }
  0x25   :  { %950 = vmatprep.subr.bf16.mxu0 %v1095_v12  ;;  %v1110_v27 = vld [vmem:[#allocation5 + $0x88] sm:$0xff]   ;;  %v1114_v33 = vld [vmem:[#allocation5 + $0x80] sm:$0xff]   ;;  %v1116_v39 = vld [vmem:[#allocation5 + $0x138] sm:$0xff]  }
  0x26   :  { %971 = vmatpush3.bf16.msra.mxu1 %v1094_v11  ;;  %v54_v34 = vld [vmem:[#allocation2] sm:$0xff]  ;;  %v57_v37 = vld [vmem:[#allocation2 + $0x18] sm:$0xff]  ;;  %503 = vmatprep.mubr.bf16.mxu0 %v62_v32  ;;  %v56_v40 = vld [vmem:[#allocation2 + $0x10] sm:$0xff] }
  0x27   :  { %972 = vmatprep.subr.bf16.mxu1 %v1097_v14  ;;  %v61_v35 = vpack.c.bf16 %v54_v34, %v54_v34  ;;  %v64_v38 = vpack.c.bf16 %v57_v37, %v57_v37  ;;  %v63_v41 = vpack.c.bf16 %v56_v40, %v56_v40  ;;  %v1117_v42 = vld [vmem:[#allocation5 + $0x170] sm:$0xff]   ;;  %v1119_v45 = vld [vmem:[#allocation5 + $0x168] sm:$0xff]   ;;  %v1121_v47 = vld [vmem:[#allocation5 + $0x160] sm:$0xff]  }
  0x28   :  { %951 = vmatpush3.bf16.msra.mxu0 %v1096_v13  ;;  %v1118_v43 = vld [vmem:[#allocation5 + $0x130] sm:$0xff]   ;;  %v1120_v46 = vld [vmem:[#allocation5 + $0x128] sm:$0xff]   ;;  %v1122_v48 = vld [vmem:[#allocation5 + $0x120] sm:$0xff]  }
  0x29   :  { %952 = vmatprep.subr.bf16.mxu0 %v1099_v16  ;;  %543 = vmatprep.mubr.bf16.mxu1 %v64_v38  ;;  %v1123_v49 = vld [vmem:[#allocation5 + $0x158] sm:$0xff]   ;;  %v1125_v51 = vld [vmem:[#allocation5 + $0x150] sm:$0xff]   ;;  %v1131_v53 = vld [vmem:[#allocation5 + $0x180] sm:$0xff]  }
  0x2a   :  { %973 = vmatpush3.bf16.msra.mxu1 %v1098_v15  ;;  %v1124_v50 = vld [vmem:[#allocation5 + $0x118] sm:$0xff]   ;;  %v1126_v52 = vld [vmem:[#allocation5 + $0x110] sm:$0xff]   ;;  %v1127_v55 = vld [vmem:[#allocation5 + $0x148] sm:$0xff]  }
  0x2b   :  { %974 = vmatprep.subr.bf16.mxu1 %v1101_v18  ;;  %v59_v54 = vld [vmem:[#allocation2 + $0x28] sm:$0xff]  ;;  %v60_v57 = vld [vmem:[#allocation2 + $0x30] sm:$0xff]  ;;  %v1128_v59 = vld [vmem:[#allocation5 + $0x108] sm:$0xff]  }
  0x2c   :  { %953 = vmatpush3.bf16.msra.mxu0 %v1100_v17  ;;  %v66_v56 = vpack.c.bf16 %v59_v54, %v59_v54  ;;  %v67_v58 = vpack.c.bf16 %v60_v57, %v60_v57  ;;  %v1129_v60 = vld [vmem:[#allocation5 + $0x140] sm:$0xff]   ;;  %v58_v62 = vld [vmem:[#allocation2 + $0x20] sm:$0xff]  ;;  %v1133_v1 = vld [vmem:[%s1353_s3 + $0x30] sm:$0xff]  }
  0x2d   :  { %954 = vmatprep.subr.bf16.mxu0 %v1103_v20  ;;  %v1130_v61 = vld [vmem:[#allocation5 + $0x100] sm:$0xff]   ;;  %v65_v63 = vpack.c.bf16 %v58_v62, %v58_v62  ;;  %v1134_v2 = vld [vmem:[%s1353_s3 + $0x28] sm:$0xff]   ;;  %v1135_v3 = vld [vmem:[%s1353_s3 + $0x20] sm:$0xff]  }
  0x2e   :  { %975 = vmatpush3.bf16.msra.mxu1 %v1102_v19  ;;  %v1132_v0 = vld [vmem:[%s1353_s3 + $0x38] sm:$0xff]   ;;  %v1137_v5 = vld [vmem:[%s1353_s3 + $0x10] sm:$0xff]   ;;  %v1138_v6 = vld [vmem:[%s1353_s3 + $0x8] sm:$0xff]  }
  0x2f   :  { %976 = vmatprep.subr.bf16.mxu1 %v1105_v22  ;;  %v1136_v4 = vld [vmem:[%s1353_s3 + $0x18] sm:$0xff]   ;;  %v1139_v7 = vld [vmem:[%s1353_s3] sm:$0xff]   ;;  %v1141_v9 = vld [vmem:[%s1355_s5 + $0x30] sm:$0xff]  }
  0x30   :  { %955 = vmatpush3.bf16.msra.mxu0 %v1104_v21  ;;  %v1140_v8 = vld [vmem:[%s1355_s5 + $0x38] sm:$0xff]   ;;  %v1142_v10 = vld [vmem:[%s1355_s5 + $0x28] sm:$0xff]   ;;  %v1143_v11 = vld [vmem:[%s1355_s5 + $0x20] sm:$0xff]  }
  0x31   :  { %956 = vmatprep.subr.bf16.mxu0 %v1107_v24  ;;  %v1144_v12 = vld [vmem:[%s1355_s5 + $0x18] sm:$0xff]   ;;  %v1145_v13 = vld [vmem:[%s1355_s5 + $0x10] sm:$0xff]   ;;  %v1146_v40 = vld [vmem:[%s1355_s5 + $0x8] sm:$0xff]  }
  0x32   :  { %977 = vmatpush3.bf16.msra.mxu1 %v1106_v23 }
  0x33   :  { %978 = vmatprep.subr.bf16.mxu1 %v1109_v26 }
  0x34   :  { %957 = vmatpush3.bf16.msra.mxu0 %v1108_v25 }
  0x35   :  { %958 = vmatprep.subr.bf16.mxu0 %v1111_v28 }
  0x36   :  { %979 = vmatpush3.bf16.msra.mxu1 %v1110_v27  ;;  %v875_v27 = vld [vmem:[%s1352_s2] ss:$0 sm:$0xff] }
  0x37   :  { %980 = vmatprep.subr.bf16.mxu1 %v1113_v30 }
  0x38   :  { %959 = vmatpush3.bf16.msra.mxu0 %v1112_v29 }
  0x39   :  { %988 = vmatprep.subr.bf16.mxu0 %v1115_v36 }
  0x3a   :  { %981 = vmatpush3.bf16.msra.mxu1 %v1114_v33 }
  0x3b   :  { %504 = vmatmul.mubr.bf16.vlgmr.msra.gmra.mxu0 %v61_v35  ;;  %1030 = vmatprep.subr.bf16.mxu1 %v1218_v44 }
  0x3c   :  { %989 = vmatpush3.bf16.msra.mxu0 %v1116_v39  ;;  %583 = vmatprep.mubr.bf16.mxu0 %v66_v56 }
  0x3d   :  { %544 = vmatmul.mubr.bf16.vlgmr.msra.gmra.mxu1 %v63_v41  ;;  %990 = vmatprep.subr.bf16.mxu0 %v1117_v42  ;;  %v1147_v41 = vld [vmem:[%s1355_s5] sm:$0xff]  }
  0x3e   :  { %1032 = vmatprep.mubr.msk.bf16.mxu1 %vm1219_vm0, %v1218_v44  ;;  %1031 = vmatpush3.bf16.msra.mxu1 %v1131_v53  ;;  %v926_v42 = vld [vmem:[%s1354_s4] ss:$0 sm:$0xff]  ;;  %s1188_s4 = scalar_lea.vmem %s866_s23, 128 }
  0x3f   :  { %1036 = vmatprep.subr.bf16.mxu1 %v1218_v44  ;;  %p1189_p10 = scmp.ne.s32.totalorder %s866_s23, %s1188_s4  ;;  %p1194_p12 = scmp.lt.s32.totalorder %s1188_s4, %s1188_s4 }
  0x40   :  { %991 = vmatpush3.bf16.msra.mxu0 %v1118_v43 }
  0x41   :  { %992 = vmatprep.subr.bf16.mxu0 %v1119_v45  ;;  %p1195_p13 = por %p1194_p12, %p1193_p11 }
  0x43   :  { %p1196_p0 = pnand %p1195_p13, %p1189_p10 }
  0x44   :  { %993 = vmatpush3.bf16.msra.mxu0 %v1120_v46 }
  0x45   :  { %994 = vmatprep.subr.bf16.mxu0 %v1121_v47  ;;  %1033 = vmatmul.mubr.msk.bf16.vlgmr.msra.gmra.mxu1 %vm467_vm1, %v67_v58 }
  0x46   :  { %1052 = vmatprep.mubr.msk.bf16.mxu1 %vm1219_vm0, %v1218_v44  ;;  %1037 = vmatpush3.bf16.msra.mxu1 %v1132_v0 }
  0x47   :  { %1038 = vmatprep.subr.bf16.mxu1 %v1218_v44 }
  0x48   :  { %995 = vmatpush3.bf16.msra.mxu0 %v1122_v48 }
  0x49   :  { %996 = vmatprep.subr.bf16.mxu0 %v1123_v49 }
  0x4a   :  { %1039 = vmatpush3.bf16.msra.mxu1 %v1133_v1 }
  0x4b   :  { %1040 = vmatprep.subr.bf16.mxu1 %v1218_v44 }
  0x4c   :  { %997 = vmatpush3.bf16.msra.mxu0 %v1124_v50 }
  0x4d   :  { %998 = vmatprep.subr.bf16.mxu0 %v1125_v51 }
  0x4e   :  { %1041 = vmatpush3.bf16.msra.mxu1 %v1134_v2 }
  0x4f   :  { %1042 = vmatprep.subr.bf16.mxu1 %v1218_v44 }
  0x50   :  { %999 = vmatpush3.bf16.msra.mxu0 %v1126_v52 }
  0x51   :  { %1000 = vmatprep.subr.bf16.mxu0 %v1127_v55 }
  0x52   :  { %1043 = vmatpush3.bf16.msra.mxu1 %v1135_v3 }
  0x53   :  { %1044 = vmatprep.subr.bf16.mxu1 %v1218_v44 }
  0x54   :  { %1001 = vmatpush3.bf16.msra.mxu0 %v1128_v59 }
  0x55   :  { %1002 = vmatprep.subr.bf16.mxu0 %v1129_v60 }
  0x56   :  { %1045 = vmatpush3.bf16.msra.mxu1 %v1136_v4 }
  0x57   :  { %1046 = vmatprep.subr.bf16.mxu1 %v1218_v44 }
  0x58   :  { %1003 = vmatpush3.bf16.msra.mxu0 %v1130_v61 }
  0x59   :  { %1056 = vmatprep.subr.bf16.mxu0 %v1218_v44 }
  0x5a   :  { %1047 = vmatpush3.bf16.msra.mxu1 %v1137_v5 }
  0x5b   :  { %584 = vmatmul.mubr.bf16.vlgmr.msra.gmra.mxu0 %v65_v63  ;;  %1048 = vmatprep.subr.bf16.mxu1 %v1218_v44 }
  0x5c   :  { %1072 = vmatprep.mubr.msk.bf16.mxu0 %vm1219_vm0, %v1218_v44  ;;  %1057 = vmatpush3.bf16.msra.mxu0 %v1140_v8 }
  0x5d   :  { %1058 = vmatprep.subr.bf16.mxu0 %v1218_v44 }
  0x5e   :  { %1049 = vmatpush3.bf16.msra.mxu1 %v1138_v6 }
  0x5f   :  { %1050 = vmatprep.subr.bf16.mxu1 %v1218_v44 }
  0x60   :  { %1059 = vmatpush3.bf16.msra.mxu0 %v1141_v9 }
  0x61   :  { %1060 = vmatprep.subr.bf16.mxu0 %v1218_v44 }
  0x62   :  { %1051 = vmatpush3.bf16.msra.mxu1 %v1139_v7 }
  0x64   :  { %1061 = vmatpush3.bf16.msra.mxu0 %v1142_v10 }
  0x65   :  { %1062 = vmatprep.subr.bf16.mxu0 %v1218_v44 }
  0x68   :  { %1063 = vmatpush3.bf16.msra.mxu0 %v1143_v11 }
  0x69   :  { %1064 = vmatprep.subr.bf16.mxu0 %v1218_v44 }
  0x6c   :  { %1065 = vmatpush3.bf16.msra.mxu0 %v1144_v12 }
  0x6d   :  { %1066 = vmatprep.subr.bf16.mxu0 %v1218_v44 }
  0x70   :  { %1067 = vmatpush3.bf16.msra.mxu0 %v1145_v13 }
  0x71   :  { %1068 = vmatprep.subr.bf16.mxu0 %v1218_v44 }
  0x74   :  { %1069 = vmatpush3.bf16.msra.mxu0 %v1146_v40 }
  0x75   :  { %1070 = vmatprep.subr.bf16.mxu0 %v1218_v44  ;;  %v935_v44 = vld [vmem:[%s1356_s6] ss:$0 sm:$0xff] }
  0x78   :  { %1071 = vmatpush3.bf16.msra.mxu0 %v1147_v41 }
  0xfb   :  { %v960_v14 = vpop.f32.mrf.mxu0 }
  0xfd   :  { %v961_v15 = vpop.f32.mrf.mxu0  ;;  %v982_v16 = vpop.f32.mrf.mxu1 }
  0xfe   :  { %v962_v26 = vadd.f32 %v961_v15, %v960_v14 }
  0xff   :  { %v963_v17 = vpop.f32.mrf.mxu0  ;;  %v983_v18 = vpop.f32.mrf.mxu1 }
 0x100   :  { %v506_v28 = vadd.f32 %v962_v26, %v875_v27  ;;  %v984_v29 = vadd.f32 %v983_v18, %v982_v16 }
 0x101   :  { %v964_v19 = vpop.f32.mrf.mxu0  ;;  %v985_v20 = vpop.f32.mrf.mxu1 }
 0x102   :  { %v546_v32 = vadd.f32 %v984_v29, %v506_v28 }
 0x103   :  { %v986_v21 = vpop.f32.mrf.mxu1 }
 0x105   :  { %v625_v22 = vpop.f32.mrf.mxu1 }
 0x107   :  { %v1034_v23 = vpop.f32.mrf.mxu1 }
 0x109   :  { %v628_v24 = vpop.f32.mrf.mxu1 }
 0x10b   :  { %v1035_v25 = vpop.f32.mrf.mxu1 }
 0x11b   :  { %v1004_v30 = vpop.f32.mrf.mxu0 }
 0x11d   :  { %v1005_v31 = vpop.f32.mrf.mxu0 }
 0x11e   :  { %v1006_v33 = vadd.f32 %v1005_v31, %v1004_v30 }
 0x11f   :  { %v1007_v34 = vpop.f32.mrf.mxu0 }
 0x120   :  { %v586_v35 = vadd.f32 %v1006_v33, %v546_v32 }
 0x121   :  { %v1008_v36 = vpop.f32.mrf.mxu0 }
 0x122   :  { %v626_v37 = vadd.f32 %v625_v22, %v586_v35 }
 0x124   :  { %v631_v38 = vmax.f32 %v626_v37, 0.0 }
 0x126   :  { %v632_v39 = vpack.c.bf16 %v631_v38, %v631_v38 }
 0x128   :  { %1053 = vmatmul.mubr.bf16.vlgmr.msra.gmra.mxu1 %v632_v39 }
 0x1e8   :  { %v738_v43 = vpop.f32.mrf.mxu1 }
 0x1e9   :  { %v739_v45 = vadd.f32 %v926_v42, %v738_v43 }
 0x1ea   :  { %v1054_v46 = vpop.f32.mrf.mxu1 }
 0x1eb   :  { %v744_v47 = vmax.f32 %v739_v45, 0.0 }
 0x1ec   :  { %v741_v48 = vpop.f32.mrf.mxu1 }
 0x1ed   :  { %v745_v49 = vpack.c.bf16 %v744_v47, %v744_v47 }
 0x1ee   :  { %v1055_v50 = vpop.f32.mrf.mxu1 }
 0x1ef   :  { %1073 = vmatmul.mubr.bf16.vlgmr.msra.gmra.mxu0 %v745_v49 }
 0x2af   :  { %v851_v51 = vpop.f32.mrf.mxu0 }
 0x2b0   :  { %v852_v52 = vadd.f32 %v935_v44, %v851_v51 }
 0x2b1   :  { %v1074_v53 = vpop.f32.mrf.mxu0 }
 0x2b2   :  { %858 = vst.msk [vmem:[#allocation7] sm:$0xff] %vm857_vm2, %v852_v52 }
 0x2b3   :  { %v854_v54 = vpop.f32.mrf.mxu0 }
 0x2b4   :  { %1199 = shalt.err (!%p1196_p0)
}
 0x2b5   :  { %868 = dma.vmem_to_hbm [thread:$0]  %s866_s23, 128, %s1357_s7, [#allocation4]   ;;  %v1075_v55 = vpop.f32.mrf.mxu0 }
 0x2b6   :  { %1212 = dma.done.wait [#allocation4], 128  }
 0x2b7   :  { %1213 = vsyncadd [#allocation4], 4294967168 }
 0x2b8   :  { %872 = vsyncpa [#allocation3], 1 }
 0x2b9   :  { %873 = vsyncpa [#allocation6], 1 }
 0x2ba   :  { %874 = vsyncpa [#allocation4], 1 }

</bundles_post_ra>
